<compile_context>
chip_gen: v7x
topology: tpu7x:2x2x1
jax: 0.10.0
libtpu: 0.0.40
codegen_flags: <defaults>
</compile_context>

<pallas_src>
import jax
import jax.numpy as jnp
from jax.experimental import pallas as pl
from jax.experimental.pallas import tpu as pltpu


def _embedding_gather_kernel(ids_ref, table_hbm, out_ref, gather_buf, sems):
    # ids_ref:    (Np,)  int32 in SMEM (scalar-prefetched, already clamped to [0, V))
    # table_hbm:  (V, D) embedding table, resident in HBM (never copied wholesale)
    # out_ref:    (T, D) VMEM output tile for this grid step
    # gather_buf: (T, D) VMEM scratch the row DMAs land in
    # sems:       (T,)   DMA semaphores, one per in-flight row copy
    T = out_ref.shape[0]
    base = pl.program_id(0) * T

    # Launch T independent row-gather DMAs (all concurrently in flight).
    @pl.loop(0, T)
    def _start(t):
        tok = ids_ref[base + t]
        pltpu.make_async_copy(table_hbm.at[tok], gather_buf.at[t], sems.at[t]).start()

    # Drain them (descriptor shape matches what was started: one (D,) row).
    @pl.loop(0, T)
    def _wait(t):
        pltpu.make_async_copy(table_hbm.at[0], gather_buf.at[t], sems.at[t]).wait()

    # Single lane-dense full-tile store into the pipelined output block.
    out_ref[...] = gather_buf[...]


def embedding_forward(input_batch: jax.Array, table: jax.Array,
                      *, token_tile: int = 128) -> jax.Array:
    """Pallas equivalent of nn.Embedding(vocab, d_model, padding_idx=0)(input_batch).

    input_batch: (B, S) int token ids
    table:       (V, D) embedding weight (row pad_idx already zeroed)
    returns:     (B, S, D) in table.dtype
    """
    B, S = input_batch.shape
    V, D = table.shape
    N = B * S

    # nn.Embedding raises on out-of-range ids; here we clamp so the DMA gather
    # can never go out of bounds.  (Exact OOB-error semantics are untranslatable.)
    ids_flat = jnp.clip(input_batch.reshape(N).astype(jnp.int32), 0, V - 1)

    # Pad the token count up to a multiple of the tile with pad tokens (id 0),
    # then slice the padding off afterwards.
    T = token_tile
    num_tiles = (N + T - 1) // T
    Np = num_tiles * T
    if Np != N:
        ids_flat = jnp.pad(ids_flat, (0, Np - N))

    # NOTE: for very large N, chunk the id prefetch instead of placing all Np
    # ids in SMEM at once; for typical (B*S) this is a few KiB and is fine.
    out_flat = pl.pallas_call(
        _embedding_gather_kernel,
        out_shape=jax.ShapeDtypeStruct((Np, D), table.dtype),
        grid_spec=pltpu.PrefetchScalarGridSpec(
            num_scalar_prefetch=1,                 # ids -> SMEM
            grid=(num_tiles,),
            in_specs=[
                pl.BlockSpec(memory_space=pl.ANY),  # table stays in HBM
            ],
            out_specs=pl.BlockSpec((T, D), lambda i, ids: (i, 0)),
            scratch_shapes=[
                pltpu.VMEM((T, D), table.dtype),    # gather landing buffer
                pltpu.SemaphoreType.DMA((T,)),      # one sem per in-flight row
            ],
        ),
        compiler_params=pltpu.CompilerParams(
            dimension_semantics=("parallel",),      # token axis -> megacore shard
        ),
    )(ids_flat, table)

    return out_flat[:N].reshape(B, S, D)


if __name__ == "__main__":
    # Module hyperparameters (small, consistent with the forward pass).
    vocab_size = 64
    d_model = 128          # multiple of 128 -> lane-dense output stores
    pad_idx = 0
    B, S = 2, 8

    key = jax.random.PRNGKey(0)
    k_w, k_ids = jax.random.split(key)

    # nn.Embedding default init: N(0, 1); padding_idx row zeroed (forward-exact).
    # TODO(synk): padding_idx gradient masking of nn.Embedding applies only to
    # the backward pass and is not implemented here (forward-only kernel).
    table = jax.random.normal(k_w, (vocab_size, d_model), dtype=jnp.float32)
    table = table.at[pad_idx].set(0.0)

    # Deterministic token ids, including a pad token.
    input_batch = jax.random.randint(k_ids, (B, S), 0, vocab_size, dtype=jnp.int32)
    input_batch = input_batch.at[0, 0].set(pad_idx)   # exercise padding_idx

    out = embedding_forward(input_batch, table)
    out = jax.block_until_ready(out)

    # Reference check against a plain JAX gather — row copies must be exact.
    ref = jnp.take(table, input_batch, axis=0)
    assert out.shape == (B, S, d_model)
    assert jnp.array_equal(out, ref), "mismatch vs reference gather"
    assert jnp.all(out[0, 0] == 0.0), "padding row must be zero"

    print("KERNEL_OK")
</pallas_src>

<mosaic_0001>
module attributes {stable_mosaic.version = 11 : i64} {
  func.func @_embedding_gather_kernel(%arg0: i32, %arg1: memref<128xi32, #tpu.memory_space<smem>>, %arg2: memref<64x128xf32, #tpu.memory_space<any>>, %arg3: memref<128x128xf32, #tpu.memory_space<vmem>>, %arg4: memref<128x128xf32, #tpu.memory_space<vmem>>, %arg5: memref<128x!tpu.dma_semaphore, #tpu.memory_space<semaphore_mem>>) attributes {dimension_semantics = [#tpu.dimension_semantics<parallel>], iteration_bounds = array<i64: 1>, scalar_prefetch = 1 : i64, scratch_operands = 2 : i64, tpu.core_type = #tpu.core_type<tc>, window_params = [{}, {transform_indices = @transform_1, window_bounds = array<i64: 128, 128>}]} {
    %c128_i32 = arith.constant 128 : i32
    %0 = arith.muli %arg0, %c128_i32 : i32
    %c0_i32 = arith.constant 0 : i32
    %c128_i32_0 = arith.constant 128 : i32
    %1 = arith.addi %c0_i32, %c128_i32_0 : i32
    %c1_i32 = arith.constant 1 : i32
    scf.for %arg6 = %c0_i32 to %1 step %c1_i32  : i32 {
      %c1_i32_9 = arith.constant 1 : i32
      %5 = arith.muli %arg6, %c1_i32_9 : i32
      %c0_i32_10 = arith.constant 0 : i32
      %6 = arith.addi %c0_i32_10, %5 : i32
      %7 = arith.addi %0, %6 : i32
      %8 = arith.index_cast %7 : i32 to index
      %9 = memref.load %arg1[%8] : memref<128xi32, #tpu.memory_space<smem>>
      %c0_i32_11 = arith.constant 0 : i32
      %10 = tpu.memref_slice %arg2[%9, %c0_i32_11] : memref<64x128xf32, #tpu.memory_space<any>> -> memref<1x128xf32, #tpu.memory_space<any>>
      %11 = tpu.memref_squeeze %10 : memref<1x128xf32, #tpu.memory_space<any>> -> memref<128xf32, #tpu.memory_space<any>>
      %c0_i32_12 = arith.constant 0 : i32
      %12 = tpu.memref_slice %arg4[%6, %c0_i32_12] : memref<128x128xf32, #tpu.memory_space<vmem>> -> memref<1x128xf32, #tpu.memory_space<vmem>>
      %13 = tpu.memref_squeeze %12 : memref<1x128xf32, #tpu.memory_space<vmem>> -> memref<128xf32, #tpu.memory_space<vmem>>
      %14 = tpu.memref_slice %arg5[%6] : memref<128x!tpu.dma_semaphore, #tpu.memory_space<semaphore_mem>> -> memref<1x!tpu.dma_semaphore, #tpu.memory_space<semaphore_mem>>
      %15 = tpu.memref_squeeze %14 : memref<1x!tpu.dma_semaphore, #tpu.memory_space<semaphore_mem>> -> memref<!tpu.dma_semaphore, #tpu.memory_space<semaphore_mem>>
      tpu.enqueue_dma source(%11 : memref<128xf32, #tpu.memory_space<any>>) target(%13 : memref<128xf32, #tpu.memory_space<vmem>>) target_semaphore(%15 : memref<!tpu.dma_semaphore, #tpu.memory_space<semaphore_mem>>)
    }
    %c128_i32_1 = arith.constant 128 : i32
    %c0_i32_2 = arith.constant 0 : i32
    %c128_i32_3 = arith.constant 128 : i32
    %2 = arith.addi %c0_i32_2, %c128_i32_3 : i32
    %c1_i32_4 = arith.constant 1 : i32
    scf.for %arg6 = %c0_i32_2 to %2 step %c1_i32_4  : i32 {
      %c1_i32_9 = arith.constant 1 : i32
      %5 = arith.muli %arg6, %c1_i32_9 : i32
      %c0_i32_10 = arith.constant 0 : i32
      %6 = arith.addi %c0_i32_10, %5 : i32
      %c0_i32_11 = arith.constant 0 : i32
      %c0_i32_12 = arith.constant 0 : i32
      %7 = tpu.memref_slice %arg2[%c0_i32_11, %c0_i32_12] : memref<64x128xf32, #tpu.memory_space<any>> -> memref<1x128xf32, #tpu.memory_space<any>>
      %8 = tpu.memref_squeeze %7 : memref<1x128xf32, #tpu.memory_space<any>> -> memref<128xf32, #tpu.memory_space<any>>
      %c0_i32_13 = arith.constant 0 : i32
      %9 = tpu.memref_slice %arg4[%6, %c0_i32_13] : memref<128x128xf32, #tpu.memory_space<vmem>> -> memref<1x128xf32, #tpu.memory_space<vmem>>
      %10 = tpu.memref_squeeze %9 : memref<1x128xf32, #tpu.memory_space<vmem>> -> memref<128xf32, #tpu.memory_space<vmem>>
      %11 = tpu.memref_slice %arg5[%6] : memref<128x!tpu.dma_semaphore, #tpu.memory_space<semaphore_mem>> -> memref<1x!tpu.dma_semaphore, #tpu.memory_space<semaphore_mem>>
      %12 = tpu.memref_squeeze %11 : memref<1x!tpu.dma_semaphore, #tpu.memory_space<semaphore_mem>> -> memref<!tpu.dma_semaphore, #tpu.memory_space<semaphore_mem>>
      tpu.wait_dma2 semaphore(%12 : memref<!tpu.dma_semaphore, #tpu.memory_space<semaphore_mem>>) src(%8 : memref<128xf32, #tpu.memory_space<any>>) dst(%10 : memref<128xf32, #tpu.memory_space<vmem>>)
    }
    %c128_i32_5 = arith.constant 128 : i32
    %c0 = arith.constant 0 : index
    %c0_6 = arith.constant 0 : index
    %3 = vector.load %arg4[%c0, %c0_6] : memref<128x128xf32, #tpu.memory_space<vmem>>, vector<128x128xf32>
    %c0_7 = arith.constant 0 : index
    %c0_8 = arith.constant 0 : index
    %4 = vector.load %arg3[%c0_7, %c0_8] : memref<128x128xf32, #tpu.memory_space<vmem>>, vector<128x128xf32>
    tpu.vector_store %arg3[%c0_7, %c0_8], %3 {strides = array<i32>} : memref<128x128xf32, #tpu.memory_space<vmem>>, vector<128x128xf32>,
    return
  }
  func.func @transform_1(%arg0: i32, %arg1: memref<128xi32, #tpu.memory_space<smem>>) -> (i32, i32) {
    %c0_i32 = arith.constant 0 : i32
    %c0_i32_0 = arith.constant 0 : i32
    return %arg0, %c0_i32 : i32, i32
  }
}

</mosaic_0001>

<bundles_post_ra>
// kernel: tpu_custom_call.1
= control target key start
LH: loop header
LB: loop body
LE: loop exit
PB: predicated region body
PF: predicated region fallthrough
CT: control target
= control target key end

     0   :  { %s1294_s0 = inlined_call_operand.hbm [shape: s32[128], index: 0, kind: input, shape index: {}]   ;;  %s1295_s1 = inlined_call_operand.hbm [shape: f32[64,128], index: 1, kind: input, shape index: {}]   ;;  %s1296_s2 = inlined_call_operand.hbm [shape: f32[128,128], index: 2, kind: output, shape index: {}]  }
   0x1   :  { %s1152_s11 = scalar_lea.hbm %s1294_s0, 16 }
   0x2   :  { %p1153_p0 = scmp.ne.s32.totalorder %s1294_s0, %s1152_s11  ;;  %p1156_p1 = scmp.lt.u32.totalorder %s1152_s11, %s1294_s0 }
   0x4   :  { %p1158_p2 = pnand %p1156_p1, %p1153_p0 }
   0x6   :  { %1161 = shalt.err (!%p1158_p2)  }
   0x7   :  { %s1230_s16 = smov [#allocation5]  }
   0x8   :  { %8 = dma.hbm_to_smem %s1294_s0, 16, %s1230_s16, [#allocation4] }
   0x9   :  { %1216 = dma.done.wait [#allocation4], 16 }
   0xa   :  { %1217 = vsyncadd [#allocation4], 4294967280 }
   0xb   :  { %10 = sfence }
   0xc   :  { %11 = vsyncpa [#allocation7], 0  ;;  %s1262_s19 = smov 0  }
   0xd LB: > { %s20_s20 = sld [smem:[#allocation5 + %s1224_s19]]  ;;  %s23_s21 = scalar_lea.vmem [#allocation2], %s1224_s19  ;;  %s1224_s19 = sphi %s1262_s19, %s18_s19  }
   0xe   : > { %s32_s22 = sshll.u32 %s23_s21, 4  ;;  %s24_s26 = scalar_lea.sflag [#allocation3], %s1224_s19  ;;  %s33_s22 = int_to_ptr.vmem [resolvable:$true] %s32_s22 }
   0xf   : > { %s1164_s30 = scalar_lea.hbm %s1295_s1, 1024 }
  0x13   : > { %s1003_s23 = sshll.u32 %s20_s20, 4 }
  0x14   : > { %s22_s25 = scalar_lea.hbm %s1295_s1, %s1003_s23 }
  0x15   : > { %s1162_s27 = scalar_lea.hbm %s22_s25, 16  ;;  %p1165_p4 = scmp.lt.u32.totalorder %s22_s25, %s1295_s1 }
  0x16   : > { %p1163_p3 = scmp.ne.s32.totalorder %s22_s25, %s1162_s27  ;;  %p1166_p5 = scmp.lt.u32.totalorder %s1164_s30, %s1162_s27 }
  0x17   : > { %p1168_p7 = scmp.lt.u32.totalorder %s1162_s27, %s22_s25 }
  0x18   : > { %p1167_p6 = por %p1166_p5, %p1165_p4 }
  0x1a   : > { %p1169_p8 = por %p1168_p7, %p1167_p6 }
  0x1c   : > { %p1170_p9 = pnand %p1169_p8, %p1163_p3 }
  0x1e   : > { %1173 = shalt.err (!%p1170_p9)  }
  0x1f   : > { %s1174_s5 = scalar_lea.vmem %s33_s22, 16  ;;  %s1231_s6 = smov [#allocation2]  }
  0x20   : > { %p1175_p10 = scmp.ne.s32.totalorder %s33_s22, %s1174_s5  ;;  %s1176_s7 = sshll.u32 %s1231_s6, 4  ;;  %s1177_s7 = int_to_ptr.vmem [resolvable:$false] %s1176_s7 }
  0x21   : > { %s1178_s8 = scalar_lea.vmem %s1177_s7, 2048  ;;  %p1179_p11 = scmp.lt.s32.totalorder %s33_s22, %s1177_s7 }
  0x22   : > { %p1180_p12 = scmp.lt.s32.totalorder %s1178_s8, %s1174_s5 }
  0x24   : > { %p1181_p13 = por %p1180_p12, %p1179_p11 }
  0x26   : > { %p1182_p0 = pnand %p1181_p13, %p1175_p10 }
  0x28   : > { %1185 = shalt.err (!%p1182_p0)  }
  0x29   : > { %35 = dma.hbm_to_vmem [thread:$0]  %s22_s25, 16, %s33_s22, %s24_s26 }
  0x2a   : > { %s18_s19 = sadd.s32 1, %s1224_s19  }
  0x2b   : > { %p15_p1 = scmp.ge.s32.totalorder %s18_s19, 128  }
  0x2c   :  { %s1226_s9 = smov (%p15_p1), 0  }
  0x2d   :  { %17 = sbr.rel (!%p15_p1) target bundleno = 13 (0xd), region = 169 }
  0x34 LB: > { %s42_s10 = scalar_lea.sflag [#allocation3], %s1228_s9  ;;  %s1228_s9 = sphi %s1226_s9, %s41_s9  }
  0x35   : > { %1218 = dma.done.wait %s42_s10, 16 }
  0x36   : > { %1219 = vsyncadd %s42_s10, 4294967280  ;;  %s41_s9 = sadd.s32 1, %s1228_s9  }
  0x37   : > { %p38_p2 = scmp.ge.s32.totalorder %s41_s9, 128  }
  0x38   :  { %v45_v0 = vld [vmem:[#allocation2] sm:$0xff] (%p38_p2)  ;;  %v46_v1 = vld [vmem:[#allocation2 + $0x8] sm:$0xff] (%p38_p2)  ;;  %v47_v2 = vld [vmem:[#allocation2 + $0x10] sm:$0xff] (%p38_p2)  ;;  %s1232_s1 = smov (%p38_p2), [#allocation6]  }
  0x39   :  { %40 = sbr.rel (!%p38_p2) target bundleno = 52 (0x34), region = 180  ;;  %61 = vst [vmem:[#allocation6] sm:$0xff] (%p38_p2), %v45_v0  ;;  %62 = vst [vmem:[#allocation6 + $0x8] sm:$0xff] (%p38_p2), %v46_v1  ;;  %v48_v3 = vld [vmem:[#allocation2 + $0x18] sm:$0xff] (%p38_p2)  ;;  %v49_v4 = vld [vmem:[#allocation2 + $0x20] sm:$0xff] (%p38_p2)  ;;  %s82_s11 = sshll.u32 (%p38_p2), %s1232_s1, 4  ;;  %s83_s11 = int_to_ptr.vmem [resolvable:$true] %s82_s11 }
  0x3a   :  { %63 = vst [vmem:[#allocation6 + $0x10] sm:$0xff] (%p38_p2), %v47_v2  ;;  %v50_v5 = vld [vmem:[#allocation2 + $0x28] sm:$0xff] (%p38_p2)  ;;  %64 = vst [vmem:[#allocation6 + $0x18] sm:$0xff] (%p38_p2), %v48_v3  ;;  %v51_v6 = vld [vmem:[#allocation2 + $0x30] sm:$0xff] (%p38_p2)  ;;  %s1186_s12 = scalar_lea.vmem (%p38_p2), %s83_s11, 2048  ;;  %p1191_p4 = scmp.lt.s32.totalorder (%p38_p2), %s83_s11, %s83_s11 }
  0x3b   :  { %65 = vst [vmem:[#allocation6 + $0x20] sm:$0xff] (%p38_p2), %v49_v4  ;;  %66 = vst [vmem:[#allocation6 + $0x28] sm:$0xff] (%p38_p2), %v50_v5  ;;  %v52_v7 = vld [vmem:[#allocation2 + $0x38] sm:$0xff] (%p38_p2)  ;;  %v53_v8 = vld [vmem:[#allocation2 + $0x40] sm:$0xff] (%p38_p2)  ;;  %p1187_p3 = scmp.ne.s32.totalorder (%p38_p2), %s83_s11, %s1186_s12  ;;  %p1192_p5 = scmp.lt.s32.totalorder (%p38_p2), %s1186_s12, %s1186_s12 }
  0x3c   :  { %67 = vst [vmem:[#allocation6 + $0x30] sm:$0xff] (%p38_p2), %v51_v6  ;;  %68 = vst [vmem:[#allocation6 + $0x38] sm:$0xff] (%p38_p2), %v52_v7  ;;  %v54_v9 = vld [vmem:[#allocation2 + $0x48] sm:$0xff] (%p38_p2)  ;;  %v55_v10 = vld [vmem:[#allocation2 + $0x50] sm:$0xff] (%p38_p2) }
  0x3d   :  { %69 = vst [vmem:[#allocation6 + $0x40] sm:$0xff] (%p38_p2), %v53_v8  ;;  %v56_v11 = vld [vmem:[#allocation2 + $0x58] sm:$0xff] (%p38_p2)  ;;  %70 = vst [vmem:[#allocation6 + $0x48] sm:$0xff] (%p38_p2), %v54_v9  ;;  %v57_v12 = vld [vmem:[#allocation2 + $0x60] sm:$0xff] (%p38_p2)  ;;  %p1193_p6 = por (%p38_p2), %p1192_p5, %p1191_p4 }
  0x3e   :  { %71 = vst [vmem:[#allocation6 + $0x50] sm:$0xff] (%p38_p2), %v55_v10  ;;  %72 = vst [vmem:[#allocation6 + $0x58] sm:$0xff] (%p38_p2), %v56_v11  ;;  %v58_v13 = vld [vmem:[#allocation2 + $0x68] sm:$0xff] (%p38_p2)  ;;  %v59_v14 = vld [vmem:[#allocation2 + $0x70] sm:$0xff] (%p38_p2) }
  0x3f   :  { %73 = vst [vmem:[#allocation6 + $0x60] sm:$0xff] (%p38_p2), %v57_v12  ;;  %74 = vst [vmem:[#allocation6 + $0x68] sm:$0xff] (%p38_p2), %v58_v13  ;;  %v60_v15 = vld [vmem:[#allocation2 + $0x78] sm:$0xff] (%p38_p2)  ;;  %p1194_p7 = pnand (%p38_p2), %p1193_p6, %p1187_p3 }
  0x40   :  { %75 = vst [vmem:[#allocation6 + $0x70] sm:$0xff] %v59_v14  ;;  %76 = vst [vmem:[#allocation6 + $0x78] sm:$0xff] %v60_v15 }
  0x41   :  { %1197 = shalt.err (!%p1194_p7)
}
  0x42   :  { %s1198_s15 = scalar_lea.hbm %s1296_s2, 2048 }
  0x43   :  { %p1199_p8 = scmp.ne.s32.totalorder %s1296_s2, %s1198_s15  ;;  %p1202_p9 = scmp.lt.u32.totalorder %s1198_s15, %s1296_s2 }
  0x45   :  { %p1204_p10 = pnand %p1202_p9, %p1199_p8 }
  0x47   :  { %1207 = shalt.err (!%p1204_p10)
}
  0x48   :  { %s1233_s20 = smov 128   ;;  %s1234_s21 = smov 8  }
  0x49   :  { %88 = dma.vmem_to_hbm [thread:$0]  %s83_s11, 2048, %s1296_s2, [#allocation7], %s1233_s20, %s1233_s20, %s1234_s21  }
  0x4a   :  { %1220 = dma.done.wait [#allocation7], 2048  }
  0x4b   :  { %1221 = vsyncadd [#allocation7], 4294965248 }
  0x4c   :  { %92 = vsyncpa [#allocation7], 1 }
  0x4d   :  { %93 = vsyncmov [#allocation3] }
  0x50   :  { %s94_s0 = vpop.sfrf %93 }
  0x51   :  { %p1004_p11 = scmp.ne.s32.totalorder %s94_s0, 0 }
  0x53   :  { %98 = shalt.err (%p1004_p11)  }
  0x54   :  { %100 = vsyncmov [#allocation3 + $0x1] }
  0x57   :  { %s101_s24 = vpop.sfrf %100 }
  0x58   :  { %p1005_p12 = scmp.ne.s32.totalorder %s101_s24, 0 }
  0x5a   :  { %105 = shalt.err (%p1005_p12)  }
  0x5b   :  { %107 = vsyncmov [#allocation3 + $0x2] }
  0x5e   :  { %s108_s25 = vpop.sfrf %107 }
  0x5f   :  { %p1006_p13 = scmp.ne.s32.totalorder %s108_s25, 0 }
  0x61   :  { %112 = shalt.err (%p1006_p13)  }
  0x62   :  { %114 = vsyncmov [#allocation3 + $0x3] }
  0x65   :  { %s115_s26 = vpop.sfrf %114 }
  0x66   :  { %p1007_p0 = scmp.ne.s32.totalorder %s115_s26, 0 }
  0x68   :  { %119 = shalt.err (%p1007_p0)  }
  0x69   :  { %121 = vsyncmov [#allocation3 + $0x4] }
  0x6c   :  { %s122_s2 = vpop.sfrf %121 }
  0x6d   :  { %p1008_p1 = scmp.ne.s32.totalorder %s122_s2, 0 }
  0x6f   :  { %126 = shalt.err (%p1008_p1)  }
  0x70   :  { %128 = vsyncmov [#allocation3 + $0x5] }
  0x73   :  { %s129_s27 = vpop.sfrf %128 }
  0x74   :  { %p1009_p2 = scmp.ne.s32.totalorder %s129_s27, 0 }
  0x76   :  { %133 = shalt.err (%p1009_p2)  }
  0x77   :  { %135 = vsyncmov [#allocation3 + $0x6] }
  0x7a   :  { %s136_s28 = vpop.sfrf %135 }
  0x7b   :  { %p1010_p3 = scmp.ne.s32.totalorder %s136_s28, 0 }
  0x7d   :  { %140 = shalt.err (%p1010_p3)  }
  0x7e   :  { %142 = vsyncmov [#allocation3 + $0x7] }
  0x81   :  { %s143_s29 = vpop.sfrf %142 }
  0x82   :  { %p1011_p4 = scmp.ne.s32.totalorder %s143_s29, 0 }
  0x84   :  { %147 = shalt.err (%p1011_p4)  }
  0x85   :  { %149 = vsyncmov [#allocation3 + $0x8] }
  0x88   :  { %s150_s30 = vpop.sfrf %149 }
  0x89   :  { %p1012_p5 = scmp.ne.s32.totalorder %s150_s30, 0 }
  0x8b   :  { %154 = shalt.err (%p1012_p5)  }
  0x8c   :  { %156 = vsyncmov [#allocation3 + $0x9] }
  0x8f   :  { %s157_s3 = vpop.sfrf %156 }
  0x90   :  { %p1013_p6 = scmp.ne.s32.totalorder %s157_s3, 0 }
  0x92   :  { %161 = shalt.err (%p1013_p6)  }
  0x93   :  { %163 = vsyncmov [#allocation3 + $0xa] }
  0x96   :  { %s164_s4 = vpop.sfrf %163 }
  0x97   :  { %p1014_p7 = scmp.ne.s32.totalorder %s164_s4, 0 }
  0x99   :  { %168 = shalt.err (%p1014_p7)  }
  0x9a   :  { %170 = vsyncmov [#allocation3 + $0xb] }
  0x9d   :  { %s171_s5 = vpop.sfrf %170 }
  0x9e   :  { %p1015_p8 = scmp.ne.s32.totalorder %s171_s5, 0 }
  0xa0   :  { %175 = shalt.err (%p1015_p8)  }
  0xa1   :  { %177 = vsyncmov [#allocation3 + $0xc] }
  0xa4   :  { %s178_s6 = vpop.sfrf %177 }
  0xa5   :  { %p1016_p9 = scmp.ne.s32.totalorder %s178_s6, 0 }
  0xa7   :  { %182 = shalt.err (%p1016_p9)  }
  0xa8   :  { %184 = vsyncmov [#allocation3 + $0xd] }
  0xab   :  { %s185_s7 = vpop.sfrf %184 }
  0xac   :  { %p1017_p10 = scmp.ne.s32.totalorder %s185_s7, 0 }
  0xae   :  { %189 = shalt.err (%p1017_p10)  }
  0xaf   :  { %191 = vsyncmov [#allocation3 + $0xe] }
  0xb2   :  { %s192_s8 = vpop.sfrf %191 }
  0xb3   :  { %p1018_p11 = scmp.ne.s32.totalorder %s192_s8, 0 }
  0xb5   :  { %196 = shalt.err (%p1018_p11)  }
  0xb6   :  { %198 = vsyncmov [#allocation3 + $0xf] }
  0xb9   :  { %s199_s9 = vpop.sfrf %198 }
  0xba   :  { %p1019_p12 = scmp.ne.s32.totalorder %s199_s9, 0 }
  0xbc   :  { %203 = shalt.err (%p1019_p12)  }
  0xbd   :  { %205 = vsyncmov [#allocation3 + $0x10] }
  0xc0   :  { %s206_s10 = vpop.sfrf %205 }
  0xc1   :  { %p1020_p13 = scmp.ne.s32.totalorder %s206_s10, 0 }
  0xc3   :  { %210 = shalt.err (%p1020_p13)  }
  0xc4   :  { %212 = vsyncmov [#allocation3 + $0x11] }
  0xc7   :  { %s213_s1 = vpop.sfrf %212 }
  0xc8   :  { %p1021_p0 = scmp.ne.s32.totalorder %s213_s1, 0 }
  0xca   :  { %217 = shalt.err (%p1021_p0)  }
  0xcb   :  { %219 = vsyncmov [#allocation3 + $0x12] }
  0xce   :  { %s220_s11 = vpop.sfrf %219 }
  0xcf   :  { %p1022_p1 = scmp.ne.s32.totalorder %s220_s11, 0 }
  0xd1   :  { %224 = shalt.err (%p1022_p1)  }
  0xd2   :  { %226 = vsyncmov [#allocation3 + $0x13] }
  0xd5   :  { %s227_s12 = vpop.sfrf %226 }
  0xd6   :  { %p1023_p2 = scmp.ne.s32.totalorder %s227_s12, 0 }
  0xd8   :  { %231 = shalt.err (%p1023_p2)  }
  0xd9   :  { %233 = vsyncmov [#allocation3 + $0x14] }
  0xdc   :  { %s234_s13 = vpop.sfrf %233 }
  0xdd   :  { %p1024_p3 = scmp.ne.s32.totalorder %s234_s13, 0 }
  0xdf   :  { %238 = shalt.err (%p1024_p3)  }
  0xe0   :  { %240 = vsyncmov [#allocation3 + $0x15] }
  0xe3   :  { %s241_s14 = vpop.sfrf %240 }
  0xe4   :  { %p1025_p4 = scmp.ne.s32.totalorder %s241_s14, 0 }
  0xe6   :  { %245 = shalt.err (%p1025_p4)  }
  0xe7   :  { %247 = vsyncmov [#allocation3 + $0x16] }
  0xea   :  { %s248_s15 = vpop.sfrf %247 }
  0xeb   :  { %p1026_p5 = scmp.ne.s32.totalorder %s248_s15, 0 }
  0xed   :  { %252 = shalt.err (%p1026_p5)  }
  0xee   :  { %254 = vsyncmov [#allocation3 + $0x17] }
  0xf1   :  { %s255_s16 = vpop.sfrf %254 }
  0xf2   :  { %p1027_p6 = scmp.ne.s32.totalorder %s255_s16, 0 }
  0xf4   :  { %259 = shalt.err (%p1027_p6)  }
  0xf5   :  { %261 = vsyncmov [#allocation3 + $0x18] }
  0xf8   :  { %s262_s17 = vpop.sfrf %261 }
  0xf9   :  { %p1028_p7 = scmp.ne.s32.totalorder %s262_s17, 0 }
  0xfb   :  { %266 = shalt.err (%p1028_p7)  }
  0xfc   :  { %268 = vsyncmov [#allocation3 + $0x19] }
  0xff   :  { %s269_s18 = vpop.sfrf %268 }
 0x100   :  { %p1029_p8 = scmp.ne.s32.totalorder %s269_s18, 0 }
 0x102   :  { %273 = shalt.err (%p1029_p8)  }
 0x103   :  { %275 = vsyncmov [#allocation3 + $0x1a] }
 0x106   :  { %s276_s19 = vpop.sfrf %275 }
 0x107   :  { %p1030_p9 = scmp.ne.s32.totalorder %s276_s19, 0 }
 0x109   :  { %280 = shalt.err (%p1030_p9)  }
 0x10a   :  { %282 = vsyncmov [#allocation3 + $0x1b] }
 0x10d   :  { %s283_s20 = vpop.sfrf %282 }
 0x10e   :  { %p1031_p10 = scmp.ne.s32.totalorder %s283_s20, 0 }
 0x110   :  { %287 = shalt.err (%p1031_p10)  }
 0x111   :  { %289 = vsyncmov [#allocation3 + $0x1c] }
 0x114   :  { %s290_s21 = vpop.sfrf %289 }
 0x115   :  { %p1032_p11 = scmp.ne.s32.totalorder %s290_s21, 0 }
 0x117   :  { %294 = shalt.err (%p1032_p11)  }
 0x118   :  { %296 = vsyncmov [#allocation3 + $0x1d] }
 0x11b   :  { %s297_s22 = vpop.sfrf %296 }
 0x11c   :  { %p1033_p12 = scmp.ne.s32.totalorder %s297_s22, 0 }
 0x11e   :  { %301 = shalt.err (%p1033_p12)  }
 0x11f   :  { %303 = vsyncmov [#allocation3 + $0x1e] }
 0x122   :  { %s304_s23 = vpop.sfrf %303 }
 0x123   :  { %p1034_p13 = scmp.ne.s32.totalorder %s304_s23, 0 }
 0x125   :  { %308 = shalt.err (%p1034_p13)  }
 0x126   :  { %310 = vsyncmov [#allocation3 + $0x1f] }
 0x129   :  { %s311_s0 = vpop.sfrf %310 }
 0x12a   :  { %p1035_p0 = scmp.ne.s32.totalorder %s311_s0, 0 }
 0x12c   :  { %315 = shalt.err (%p1035_p0)  }
 0x12d   :  { %317 = vsyncmov [#allocation3 + $0x20] }
 0x130   :  { %s318_s24 = vpop.sfrf %317 }
 0x131   :  { %p1036_p1 = scmp.ne.s32.totalorder %s318_s24, 0 }
 0x133   :  { %322 = shalt.err (%p1036_p1)  }
 0x134   :  { %324 = vsyncmov [#allocation3 + $0x21] }
 0x137   :  { %s325_s25 = vpop.sfrf %324 }
 0x138   :  { %p1037_p2 = scmp.ne.s32.totalorder %s325_s25, 0 }
 0x13a   :  { %329 = shalt.err (%p1037_p2)  }
 0x13b   :  { %331 = vsyncmov [#allocation3 + $0x22] }
 0x13e   :  { %s332_s26 = vpop.sfrf %331 }
 0x13f   :  { %p1038_p3 = scmp.ne.s32.totalorder %s332_s26, 0 }
 0x141   :  { %336 = shalt.err (%p1038_p3)  }
 0x142   :  { %338 = vsyncmov [#allocation3 + $0x23] }
 0x145   :  { %s339_s2 = vpop.sfrf %338 }
 0x146   :  { %p1039_p4 = scmp.ne.s32.totalorder %s339_s2, 0 }
 0x148   :  { %343 = shalt.err (%p1039_p4)  }
 0x149   :  { %345 = vsyncmov [#allocation3 + $0x24] }
 0x14c   :  { %s346_s27 = vpop.sfrf %345 }
 0x14d   :  { %p1040_p5 = scmp.ne.s32.totalorder %s346_s27, 0 }
 0x14f   :  { %350 = shalt.err (%p1040_p5)  }
 0x150   :  { %352 = vsyncmov [#allocation3 + $0x25] }
 0x153   :  { %s353_s28 = vpop.sfrf %352 }
 0x154   :  { %p1041_p6 = scmp.ne.s32.totalorder %s353_s28, 0 }
 0x156   :  { %357 = shalt.err (%p1041_p6)  }
 0x157   :  { %359 = vsyncmov [#allocation3 + $0x26] }
 0x15a   :  { %s360_s29 = vpop.sfrf %359 }
 0x15b   :  { %p1042_p7 = scmp.ne.s32.totalorder %s360_s29, 0 }
 0x15d   :  { %364 = shalt.err (%p1042_p7)  }
 0x15e   :  { %366 = vsyncmov [#allocation3 + $0x27] }
 0x161   :  { %s367_s30 = vpop.sfrf %366 }
 0x162   :  { %p1043_p8 = scmp.ne.s32.totalorder %s367_s30, 0 }
 0x164   :  { %371 = shalt.err (%p1043_p8)  }
 0x165   :  { %373 = vsyncmov [#allocation3 + $0x28] }
 0x168   :  { %s374_s3 = vpop.sfrf %373 }
 0x169   :  { %p1044_p9 = scmp.ne.s32.totalorder %s374_s3, 0 }
 0x16b   :  { %378 = shalt.err (%p1044_p9)  }
 0x16c   :  { %380 = vsyncmov [#allocation3 + $0x29] }
 0x16f   :  { %s381_s4 = vpop.sfrf %380 }
 0x170   :  { %p1045_p10 = scmp.ne.s32.totalorder %s381_s4, 0 }
 0x172   :  { %385 = shalt.err (%p1045_p10)  }
 0x173   :  { %387 = vsyncmov [#allocation3 + $0x2a] }
 0x176   :  { %s388_s5 = vpop.sfrf %387 }
 0x177   :  { %p1046_p11 = scmp.ne.s32.totalorder %s388_s5, 0 }
 0x179   :  { %392 = shalt.err (%p1046_p11)  }
 0x17a   :  { %394 = vsyncmov [#allocation3 + $0x2b] }
 0x17d   :  { %s395_s6 = vpop.sfrf %394 }
 0x17e   :  { %p1047_p12 = scmp.ne.s32.totalorder %s395_s6, 0 }
 0x180   :  { %399 = shalt.err (%p1047_p12)  }
 0x181   :  { %401 = vsyncmov [#allocation3 + $0x2c] }
 0x184   :  { %s402_s7 = vpop.sfrf %401 }
 0x185   :  { %p1048_p13 = scmp.ne.s32.totalorder %s402_s7, 0 }
 0x187   :  { %406 = shalt.err (%p1048_p13)  }
 0x188   :  { %408 = vsyncmov [#allocation3 + $0x2d] }
 0x18b   :  { %s409_s8 = vpop.sfrf %408 }
 0x18c   :  { %p1049_p0 = scmp.ne.s32.totalorder %s409_s8, 0 }
 0x18e   :  { %413 = shalt.err (%p1049_p0)  }
 0x18f   :  { %415 = vsyncmov [#allocation3 + $0x2e] }
 0x192   :  { %s416_s9 = vpop.sfrf %415 }
 0x193   :  { %p1050_p1 = scmp.ne.s32.totalorder %s416_s9, 0 }
 0x195   :  { %420 = shalt.err (%p1050_p1)  }
 0x196   :  { %422 = vsyncmov [#allocation3 + $0x2f] }
 0x199   :  { %s423_s10 = vpop.sfrf %422 }
 0x19a   :  { %p1051_p2 = scmp.ne.s32.totalorder %s423_s10, 0 }
 0x19c   :  { %427 = shalt.err (%p1051_p2)  }
 0x19d   :  { %429 = vsyncmov [#allocation3 + $0x30] }
 0x1a0   :  { %s430_s1 = vpop.sfrf %429 }
 0x1a1   :  { %p1052_p3 = scmp.ne.s32.totalorder %s430_s1, 0 }
 0x1a3   :  { %434 = shalt.err (%p1052_p3)  }
 0x1a4   :  { %436 = vsyncmov [#allocation3 + $0x31] }
 0x1a7   :  { %s437_s11 = vpop.sfrf %436 }
 0x1a8   :  { %p1053_p4 = scmp.ne.s32.totalorder %s437_s11, 0 }
 0x1aa   :  { %441 = shalt.err (%p1053_p4)  }
 0x1ab   :  { %443 = vsyncmov [#allocation3 + $0x32] }
 0x1ae   :  { %s444_s12 = vpop.sfrf %443 }
 0x1af   :  { %p1054_p5 = scmp.ne.s32.totalorder %s444_s12, 0 }
 0x1b1   :  { %448 = shalt.err (%p1054_p5)  }
 0x1b2   :  { %450 = vsyncmov [#allocation3 + $0x33] }
 0x1b5   :  { %s451_s13 = vpop.sfrf %450 }
 0x1b6   :  { %p1055_p6 = scmp.ne.s32.totalorder %s451_s13, 0 }
 0x1b8   :  { %455 = shalt.err (%p1055_p6)  }
 0x1b9   :  { %457 = vsyncmov [#allocation3 + $0x34] }
 0x1bc   :  { %s458_s14 = vpop.sfrf %457 }
 0x1bd   :  { %p1056_p7 = scmp.ne.s32.totalorder %s458_s14, 0 }
 0x1bf   :  { %462 = shalt.err (%p1056_p7)  }
 0x1c0   :  { %464 = vsyncmov [#allocation3 + $0x35] }
 0x1c3   :  { %s465_s15 = vpop.sfrf %464 }
 0x1c4   :  { %p1057_p8 = scmp.ne.s32.totalorder %s465_s15, 0 }
 0x1c6   :  { %469 = shalt.err (%p1057_p8)  }
 0x1c7   :  { %471 = vsyncmov [#allocation3 + $0x36] }
 0x1ca   :  { %s472_s16 = vpop.sfrf %471 }
 0x1cb   :  { %p1058_p9 = scmp.ne.s32.totalorder %s472_s16, 0 }
 0x1cd   :  { %476 = shalt.err (%p1058_p9)  }
 0x1ce   :  { %478 = vsyncmov [#allocation3 + $0x37] }
 0x1d1   :  { %s479_s17 = vpop.sfrf %478 }
 0x1d2   :  { %p1059_p10 = scmp.ne.s32.totalorder %s479_s17, 0 }
 0x1d4   :  { %483 = shalt.err (%p1059_p10)  }
 0x1d5   :  { %485 = vsyncmov [#allocation3 + $0x38] }
 0x1d8   :  { %s486_s18 = vpop.sfrf %485 }
 0x1d9   :  { %p1060_p11 = scmp.ne.s32.totalorder %s486_s18, 0 }
 0x1db   :  { %490 = shalt.err (%p1060_p11)  }
 0x1dc   :  { %492 = vsyncmov [#allocation3 + $0x39] }
 0x1df   :  { %s493_s19 = vpop.sfrf %492 }
 0x1e0   :  { %p1061_p12 = scmp.ne.s32.totalorder %s493_s19, 0 }
 0x1e2   :  { %497 = shalt.err (%p1061_p12)  }
 0x1e3   :  { %499 = vsyncmov [#allocation3 + $0x3a] }
 0x1e6   :  { %s500_s20 = vpop.sfrf %499 }
 0x1e7   :  { %p1062_p13 = scmp.ne.s32.totalorder %s500_s20, 0 }
 0x1e9   :  { %504 = shalt.err (%p1062_p13)  }
 0x1ea   :  { %506 = vsyncmov [#allocation3 + $0x3b] }
 0x1ed   :  { %s507_s21 = vpop.sfrf %506 }
 0x1ee   :  { %p1063_p0 = scmp.ne.s32.totalorder %s507_s21, 0 }
 0x1f0   :  { %511 = shalt.err (%p1063_p0)  }
 0x1f1   :  { %513 = vsyncmov [#allocation3 + $0x3c] }
 0x1f4   :  { %s514_s22 = vpop.sfrf %513 }
 0x1f5   :  { %p1064_p1 = scmp.ne.s32.totalorder %s514_s22, 0 }
 0x1f7   :  { %518 = shalt.err (%p1064_p1)  }
 0x1f8   :  { %520 = vsyncmov [#allocation3 + $0x3d] }
 0x1fb   :  { %s521_s23 = vpop.sfrf %520 }
 0x1fc   :  { %p1065_p2 = scmp.ne.s32.totalorder %s521_s23, 0 }
 0x1fe   :  { %525 = shalt.err (%p1065_p2)  }
 0x1ff   :  { %527 = vsyncmov [#allocation3 + $0x3e] }
 0x202   :  { %s528_s0 = vpop.sfrf %527 }
 0x203   :  { %p1066_p3 = scmp.ne.s32.totalorder %s528_s0, 0 }
 0x205   :  { %532 = shalt.err (%p1066_p3)  }
 0x206   :  { %534 = vsyncmov [#allocation3 + $0x3f] }
 0x209   :  { %s535_s24 = vpop.sfrf %534 }
 0x20a   :  { %p1067_p4 = scmp.ne.s32.totalorder %s535_s24, 0 }
 0x20c   :  { %539 = shalt.err (%p1067_p4)  }
 0x20d   :  { %541 = vsyncmov [#allocation3 + $0x40] }
 0x210   :  { %s542_s25 = vpop.sfrf %541 }
 0x211   :  { %p1068_p5 = scmp.ne.s32.totalorder %s542_s25, 0 }
 0x213   :  { %546 = shalt.err (%p1068_p5)  }
 0x214   :  { %548 = vsyncmov [#allocation3 + $0x41] }
 0x217   :  { %s549_s26 = vpop.sfrf %548 }
 0x218   :  { %p1069_p6 = scmp.ne.s32.totalorder %s549_s26, 0 }
 0x21a   :  { %553 = shalt.err (%p1069_p6)  }
 0x21b   :  { %555 = vsyncmov [#allocation3 + $0x42] }
 0x21e   :  { %s556_s2 = vpop.sfrf %555 }
 0x21f   :  { %p1070_p7 = scmp.ne.s32.totalorder %s556_s2, 0 }
 0x221   :  { %560 = shalt.err (%p1070_p7)  }
 0x222   :  { %562 = vsyncmov [#allocation3 + $0x43] }
 0x225   :  { %s563_s27 = vpop.sfrf %562 }
 0x226   :  { %p1071_p8 = scmp.ne.s32.totalorder %s563_s27, 0 }
 0x228   :  { %567 = shalt.err (%p1071_p8)  }
 0x229   :  { %569 = vsyncmov [#allocation3 + $0x44] }
 0x22c   :  { %s570_s28 = vpop.sfrf %569 }
 0x22d   :  { %p1072_p9 = scmp.ne.s32.totalorder %s570_s28, 0 }
 0x22f   :  { %574 = shalt.err (%p1072_p9)  }
 0x230   :  { %576 = vsyncmov [#allocation3 + $0x45] }
 0x233   :  { %s577_s29 = vpop.sfrf %576 }
 0x234   :  { %p1073_p10 = scmp.ne.s32.totalorder %s577_s29, 0 }
 0x236   :  { %581 = shalt.err (%p1073_p10)  }
 0x237   :  { %583 = vsyncmov [#allocation3 + $0x46] }
 0x23a   :  { %s584_s30 = vpop.sfrf %583 }
 0x23b   :  { %p1074_p11 = scmp.ne.s32.totalorder %s584_s30, 0 }
 0x23d   :  { %588 = shalt.err (%p1074_p11)  }
 0x23e   :  { %590 = vsyncmov [#allocation3 + $0x47] }
 0x241   :  { %s591_s3 = vpop.sfrf %590 }
 0x242   :  { %p1075_p12 = scmp.ne.s32.totalorder %s591_s3, 0 }
 0x244   :  { %595 = shalt.err (%p1075_p12)  }
 0x245   :  { %597 = vsyncmov [#allocation3 + $0x48] }
 0x248   :  { %s598_s4 = vpop.sfrf %597 }
 0x249   :  { %p1076_p13 = scmp.ne.s32.totalorder %s598_s4, 0 }
 0x24b   :  { %602 = shalt.err (%p1076_p13)  }
 0x24c   :  { %604 = vsyncmov [#allocation3 + $0x49] }
 0x24f   :  { %s605_s5 = vpop.sfrf %604 }
 0x250   :  { %p1077_p0 = scmp.ne.s32.totalorder %s605_s5, 0 }
 0x252   :  { %609 = shalt.err (%p1077_p0)  }
 0x253   :  { %611 = vsyncmov [#allocation3 + $0x4a] }
 0x256   :  { %s612_s6 = vpop.sfrf %611 }
 0x257   :  { %p1078_p1 = scmp.ne.s32.totalorder %s612_s6, 0 }
 0x259   :  { %616 = shalt.err (%p1078_p1)  }
 0x25a   :  { %618 = vsyncmov [#allocation3 + $0x4b] }
 0x25d   :  { %s619_s7 = vpop.sfrf %618 }
 0x25e   :  { %p1079_p2 = scmp.ne.s32.totalorder %s619_s7, 0 }
 0x260   :  { %623 = shalt.err (%p1079_p2)  }
 0x261   :  { %625 = vsyncmov [#allocation3 + $0x4c] }
 0x264   :  { %s626_s8 = vpop.sfrf %625 }
 0x265   :  { %p1080_p3 = scmp.ne.s32.totalorder %s626_s8, 0 }
 0x267   :  { %630 = shalt.err (%p1080_p3)  }
 0x268   :  { %632 = vsyncmov [#allocation3 + $0x4d] }
 0x26b   :  { %s633_s9 = vpop.sfrf %632 }
 0x26c   :  { %p1081_p4 = scmp.ne.s32.totalorder %s633_s9, 0 }
 0x26e   :  { %637 = shalt.err (%p1081_p4)  }
 0x26f   :  { %639 = vsyncmov [#allocation3 + $0x4e] }
 0x272   :  { %s640_s10 = vpop.sfrf %639 }
 0x273   :  { %p1082_p5 = scmp.ne.s32.totalorder %s640_s10, 0 }
 0x275   :  { %644 = shalt.err (%p1082_p5)  }
 0x276   :  { %646 = vsyncmov [#allocation3 + $0x4f] }
 0x279   :  { %s647_s1 = vpop.sfrf %646 }
 0x27a   :  { %p1083_p6 = scmp.ne.s32.totalorder %s647_s1, 0 }
 0x27c   :  { %651 = shalt.err (%p1083_p6)  }
 0x27d   :  { %653 = vsyncmov [#allocation3 + $0x50] }
 0x280   :  { %s654_s11 = vpop.sfrf %653 }
 0x281   :  { %p1084_p7 = scmp.ne.s32.totalorder %s654_s11, 0 }
 0x283   :  { %658 = shalt.err (%p1084_p7)  }
 0x284   :  { %660 = vsyncmov [#allocation3 + $0x51] }
 0x287   :  { %s661_s12 = vpop.sfrf %660 }
 0x288   :  { %p1085_p8 = scmp.ne.s32.totalorder %s661_s12, 0 }
 0x28a   :  { %665 = shalt.err (%p1085_p8)  }
 0x28b   :  { %667 = vsyncmov [#allocation3 + $0x52] }
 0x28e   :  { %s668_s13 = vpop.sfrf %667 }
 0x28f   :  { %p1086_p9 = scmp.ne.s32.totalorder %s668_s13, 0 }
 0x291   :  { %672 = shalt.err (%p1086_p9)  }
 0x292   :  { %674 = vsyncmov [#allocation3 + $0x53] }
 0x295   :  { %s675_s14 = vpop.sfrf %674 }
 0x296   :  { %p1087_p10 = scmp.ne.s32.totalorder %s675_s14, 0 }
 0x298   :  { %679 = shalt.err (%p1087_p10)  }
 0x299   :  { %681 = vsyncmov [#allocation3 + $0x54] }
 0x29c   :  { %s682_s15 = vpop.sfrf %681 }
 0x29d   :  { %p1088_p11 = scmp.ne.s32.totalorder %s682_s15, 0 }
 0x29f   :  { %686 = shalt.err (%p1088_p11)  }
 0x2a0   :  { %688 = vsyncmov [#allocation3 + $0x55] }
 0x2a3   :  { %s689_s16 = vpop.sfrf %688 }
 0x2a4   :  { %p1089_p12 = scmp.ne.s32.totalorder %s689_s16, 0 }
 0x2a6   :  { %693 = shalt.err (%p1089_p12)  }
 0x2a7   :  { %695 = vsyncmov [#allocation3 + $0x56] }
 0x2aa   :  { %s696_s17 = vpop.sfrf %695 }
 0x2ab   :  { %p1090_p13 = scmp.ne.s32.totalorder %s696_s17, 0 }
 0x2ad   :  { %700 = shalt.err (%p1090_p13)  }
 0x2ae   :  { %702 = vsyncmov [#allocation3 + $0x57] }
 0x2b1   :  { %s703_s18 = vpop.sfrf %702 }
 0x2b2   :  { %p1091_p0 = scmp.ne.s32.totalorder %s703_s18, 0 }
 0x2b4   :  { %707 = shalt.err (%p1091_p0)  }
 0x2b5   :  { %709 = vsyncmov [#allocation3 + $0x58] }
 0x2b8   :  { %s710_s19 = vpop.sfrf %709 }
 0x2b9   :  { %p1092_p1 = scmp.ne.s32.totalorder %s710_s19, 0 }
 0x2bb   :  { %714 = shalt.err (%p1092_p1)  }
 0x2bc   :  { %716 = vsyncmov [#allocation3 + $0x59] }
 0x2bf   :  { %s717_s20 = vpop.sfrf %716 }
 0x2c0   :  { %p1093_p2 = scmp.ne.s32.totalorder %s717_s20, 0 }
 0x2c2   :  { %721 = shalt.err (%p1093_p2)  }
 0x2c3   :  { %723 = vsyncmov [#allocation3 + $0x5a] }
 0x2c6   :  { %s724_s21 = vpop.sfrf %723 }
 0x2c7   :  { %p1094_p3 = scmp.ne.s32.totalorder %s724_s21, 0 }
 0x2c9   :  { %728 = shalt.err (%p1094_p3)  }
 0x2ca   :  { %730 = vsyncmov [#allocation3 + $0x5b] }
 0x2cd   :  { %s731_s22 = vpop.sfrf %730 }
 0x2ce   :  { %p1095_p4 = scmp.ne.s32.totalorder %s731_s22, 0 }
 0x2d0   :  { %735 = shalt.err (%p1095_p4)  }
 0x2d1   :  { %737 = vsyncmov [#allocation3 + $0x5c] }
 0x2d4   :  { %s738_s23 = vpop.sfrf %737 }
 0x2d5   :  { %p1096_p5 = scmp.ne.s32.totalorder %s738_s23, 0 }
 0x2d7   :  { %742 = shalt.err (%p1096_p5)  }
 0x2d8   :  { %744 = vsyncmov [#allocation3 + $0x5d] }
 0x2db   :  { %s745_s0 = vpop.sfrf %744 }
 0x2dc   :  { %p1097_p6 = scmp.ne.s32.totalorder %s745_s0, 0 }
 0x2de   :  { %749 = shalt.err (%p1097_p6)  }
 0x2df   :  { %751 = vsyncmov [#allocation3 + $0x5e] }
 0x2e2   :  { %s752_s24 = vpop.sfrf %751 }
 0x2e3   :  { %p1098_p7 = scmp.ne.s32.totalorder %s752_s24, 0 }
 0x2e5   :  { %756 = shalt.err (%p1098_p7)  }
 0x2e6   :  { %758 = vsyncmov [#allocation3 + $0x5f] }
 0x2e9   :  { %s759_s25 = vpop.sfrf %758 }
 0x2ea   :  { %p1099_p8 = scmp.ne.s32.totalorder %s759_s25, 0 }
 0x2ec   :  { %763 = shalt.err (%p1099_p8)  }
 0x2ed   :  { %765 = vsyncmov [#allocation3 + $0x60] }
 0x2f0   :  { %s766_s26 = vpop.sfrf %765 }
 0x2f1   :  { %p1100_p9 = scmp.ne.s32.totalorder %s766_s26, 0 }
 0x2f3   :  { %770 = shalt.err (%p1100_p9)  }
 0x2f4   :  { %772 = vsyncmov [#allocation3 + $0x61] }
 0x2f7   :  { %s773_s2 = vpop.sfrf %772 }
 0x2f8   :  { %p1101_p10 = scmp.ne.s32.totalorder %s773_s2, 0 }
 0x2fa   :  { %777 = shalt.err (%p1101_p10)  }
 0x2fb   :  { %779 = vsyncmov [#allocation3 + $0x62] }
 0x2fe   :  { %s780_s27 = vpop.sfrf %779 }
 0x2ff   :  { %p1102_p11 = scmp.ne.s32.totalorder %s780_s27, 0 }
 0x301   :  { %784 = shalt.err (%p1102_p11)  }
 0x302   :  { %786 = vsyncmov [#allocation3 + $0x63] }
 0x305   :  { %s787_s28 = vpop.sfrf %786 }
 0x306   :  { %p1103_p12 = scmp.ne.s32.totalorder %s787_s28, 0 }
 0x308   :  { %791 = shalt.err (%p1103_p12)  }
 0x309   :  { %793 = vsyncmov [#allocation3 + $0x64] }
 0x30c   :  { %s794_s29 = vpop.sfrf %793 }
 0x30d   :  { %p1104_p13 = scmp.ne.s32.totalorder %s794_s29, 0 }
 0x30f   :  { %798 = shalt.err (%p1104_p13)  }
 0x310   :  { %800 = vsyncmov [#allocation3 + $0x65] }
 0x313   :  { %s801_s30 = vpop.sfrf %800 }
 0x314   :  { %p1105_p0 = scmp.ne.s32.totalorder %s801_s30, 0 }
 0x316   :  { %805 = shalt.err (%p1105_p0)  }
 0x317   :  { %807 = vsyncmov [#allocation3 + $0x66] }
 0x31a   :  { %s808_s3 = vpop.sfrf %807 }
 0x31b   :  { %p1106_p1 = scmp.ne.s32.totalorder %s808_s3, 0 }
 0x31d   :  { %812 = shalt.err (%p1106_p1)  }
 0x31e   :  { %814 = vsyncmov [#allocation3 + $0x67] }
 0x321   :  { %s815_s4 = vpop.sfrf %814 }
 0x322   :  { %p1107_p2 = scmp.ne.s32.totalorder %s815_s4, 0 }
 0x324   :  { %819 = shalt.err (%p1107_p2)  }
 0x325   :  { %821 = vsyncmov [#allocation3 + $0x68] }
 0x328   :  { %s822_s5 = vpop.sfrf %821 }
 0x329   :  { %p1108_p3 = scmp.ne.s32.totalorder %s822_s5, 0 }
 0x32b   :  { %826 = shalt.err (%p1108_p3)  }
 0x32c   :  { %828 = vsyncmov [#allocation3 + $0x69] }
 0x32f   :  { %s829_s6 = vpop.sfrf %828 }
 0x330   :  { %p1109_p4 = scmp.ne.s32.totalorder %s829_s6, 0 }
 0x332   :  { %833 = shalt.err (%p1109_p4)  }
 0x333   :  { %835 = vsyncmov [#allocation3 + $0x6a] }
 0x336   :  { %s836_s7 = vpop.sfrf %835 }
 0x337   :  { %p1110_p5 = scmp.ne.s32.totalorder %s836_s7, 0 }
 0x339   :  { %840 = shalt.err (%p1110_p5)  }
 0x33a   :  { %842 = vsyncmov [#allocation3 + $0x6b] }
 0x33d   :  { %s843_s8 = vpop.sfrf %842 }
 0x33e   :  { %p1111_p6 = scmp.ne.s32.totalorder %s843_s8, 0 }
 0x340   :  { %847 = shalt.err (%p1111_p6)  }
 0x341   :  { %849 = vsyncmov [#allocation3 + $0x6c] }
 0x344   :  { %s850_s9 = vpop.sfrf %849 }
 0x345   :  { %p1112_p7 = scmp.ne.s32.totalorder %s850_s9, 0 }
 0x347   :  { %854 = shalt.err (%p1112_p7)  }
 0x348   :  { %856 = vsyncmov [#allocation3 + $0x6d] }
 0x34b   :  { %s857_s10 = vpop.sfrf %856 }
 0x34c   :  { %p1113_p8 = scmp.ne.s32.totalorder %s857_s10, 0 }
 0x34e   :  { %861 = shalt.err (%p1113_p8)  }
 0x34f   :  { %863 = vsyncmov [#allocation3 + $0x6e] }
 0x352   :  { %s864_s1 = vpop.sfrf %863 }
 0x353   :  { %p1114_p9 = scmp.ne.s32.totalorder %s864_s1, 0 }
 0x355   :  { %868 = shalt.err (%p1114_p9)  }
 0x356   :  { %870 = vsyncmov [#allocation3 + $0x6f] }
 0x359   :  { %s871_s11 = vpop.sfrf %870 }
 0x35a   :  { %p1115_p10 = scmp.ne.s32.totalorder %s871_s11, 0 }
 0x35c   :  { %875 = shalt.err (%p1115_p10)  }
 0x35d   :  { %877 = vsyncmov [#allocation3 + $0x70] }
 0x360   :  { %s878_s12 = vpop.sfrf %877 }
 0x361   :  { %p1116_p11 = scmp.ne.s32.totalorder %s878_s12, 0 }
 0x363   :  { %882 = shalt.err (%p1116_p11)  }
 0x364   :  { %884 = vsyncmov [#allocation3 + $0x71] }
 0x367   :  { %s885_s13 = vpop.sfrf %884 }
 0x368   :  { %p1117_p12 = scmp.ne.s32.totalorder %s885_s13, 0 }
 0x36a   :  { %889 = shalt.err (%p1117_p12)  }
 0x36b   :  { %891 = vsyncmov [#allocation3 + $0x72] }
 0x36e   :  { %s892_s14 = vpop.sfrf %891 }
 0x36f   :  { %p1118_p13 = scmp.ne.s32.totalorder %s892_s14, 0 }
 0x371   :  { %896 = shalt.err (%p1118_p13)  }
 0x372   :  { %898 = vsyncmov [#allocation3 + $0x73] }
 0x375   :  { %s899_s15 = vpop.sfrf %898 }
 0x376   :  { %p1119_p0 = scmp.ne.s32.totalorder %s899_s15, 0 }
 0x378   :  { %903 = shalt.err (%p1119_p0)  }
 0x379   :  { %905 = vsyncmov [#allocation3 + $0x74] }
 0x37c   :  { %s906_s16 = vpop.sfrf %905 }
 0x37d   :  { %p1120_p1 = scmp.ne.s32.totalorder %s906_s16, 0 }
 0x37f   :  { %910 = shalt.err (%p1120_p1)  }
 0x380   :  { %912 = vsyncmov [#allocation3 + $0x75] }
 0x383   :  { %s913_s17 = vpop.sfrf %912 }
 0x384   :  { %p1121_p2 = scmp.ne.s32.totalorder %s913_s17, 0 }
 0x386   :  { %917 = shalt.err (%p1121_p2)  }
 0x387   :  { %919 = vsyncmov [#allocation3 + $0x76] }
 0x38a   :  { %s920_s18 = vpop.sfrf %919 }
 0x38b   :  { %p1122_p3 = scmp.ne.s32.totalorder %s920_s18, 0 }
 0x38d   :  { %924 = shalt.err (%p1122_p3)  }
 0x38e   :  { %926 = vsyncmov [#allocation3 + $0x77] }
 0x391   :  { %s927_s19 = vpop.sfrf %926 }
 0x392   :  { %p1123_p4 = scmp.ne.s32.totalorder %s927_s19, 0 }
 0x394   :  { %931 = shalt.err (%p1123_p4)  }
 0x395   :  { %933 = vsyncmov [#allocation3 + $0x78] }
 0x398   :  { %s934_s20 = vpop.sfrf %933 }
 0x399   :  { %p1124_p5 = scmp.ne.s32.totalorder %s934_s20, 0 }
 0x39b   :  { %938 = shalt.err (%p1124_p5)  }
 0x39c   :  { %940 = vsyncmov [#allocation3 + $0x79] }
 0x39f   :  { %s941_s21 = vpop.sfrf %940 }
 0x3a0   :  { %p1125_p6 = scmp.ne.s32.totalorder %s941_s21, 0 }
 0x3a2   :  { %945 = shalt.err (%p1125_p6)  }
 0x3a3   :  { %947 = vsyncmov [#allocation3 + $0x7a] }
 0x3a6   :  { %s948_s22 = vpop.sfrf %947 }
 0x3a7   :  { %p1126_p7 = scmp.ne.s32.totalorder %s948_s22, 0 }
 0x3a9   :  { %952 = shalt.err (%p1126_p7)  }
 0x3aa   :  { %954 = vsyncmov [#allocation3 + $0x7b] }
 0x3ad   :  { %s955_s23 = vpop.sfrf %954 }
 0x3ae   :  { %p1127_p8 = scmp.ne.s32.totalorder %s955_s23, 0 }
 0x3b0   :  { %959 = shalt.err (%p1127_p8)  }
 0x3b1   :  { %961 = vsyncmov [#allocation3 + $0x7c] }
 0x3b4   :  { %s962_s0 = vpop.sfrf %961 }
 0x3b5   :  { %p1128_p9 = scmp.ne.s32.totalorder %s962_s0, 0 }
 0x3b7   :  { %966 = shalt.err (%p1128_p9)  }
 0x3b8   :  { %968 = vsyncmov [#allocation3 + $0x7d] }
 0x3bb   :  { %s969_s24 = vpop.sfrf %968 }
 0x3bc   :  { %p1129_p10 = scmp.ne.s32.totalorder %s969_s24, 0 }
 0x3be   :  { %973 = shalt.err (%p1129_p10)  }
 0x3bf   :  { %975 = vsyncmov [#allocation3 + $0x7e] }
 0x3c2   :  { %s976_s25 = vpop.sfrf %975 }
 0x3c3   :  { %p1130_p11 = scmp.ne.s32.totalorder %s976_s25, 0 }
 0x3c5   :  { %980 = shalt.err (%p1130_p11)  }
 0x3c6   :  { %982 = vsyncmov [#allocation3 + $0x7f] }
 0x3c9   :  { %s983_s26 = vpop.sfrf %982 }
 0x3ca   :  { %p1131_p12 = scmp.ne.s32.totalorder %s983_s26, 0 }
 0x3cc   :  { %987 = shalt.err (%p1131_p12)  }

</bundles_post_ra>
